<compile_context>
chip_gen: v6e
topology: v6e:2x2x1
jax: 0.10.0
libtpu: 0.0.40
codegen_flags: <defaults>
</compile_context>

<pallas_src>
import jax
import jax.numpy as jnp
from jax.experimental import pallas as pl
from jax.experimental.pallas import tpu as pltpu

D_MODEL = 32
D_FF = 4 * D_MODEL          # 128 -> lane-dense weight / hidden slabs
SEQ = 8
BATCH = 2
EPS = 1e-6


def _sublayer_kernel(x_ref, w1_ref, b1_ref, w2_ref, b2_ref, out_ref):
    x = x_ref[...].astype(jnp.float32)                 # (TM, D) row tile

    # ---- LayerNorm stats in one pass (unbiased var, eps added to std) ----
    n = x.shape[-1]
    s1 = jnp.sum(x, axis=-1, keepdims=True)
    s2 = jnp.sum(x * x, axis=-1, keepdims=True)
    mean = s1 * (1.0 / n)
    var = (s2 - s1 * mean) * (1.0 / (n - 1))
    denom = jnp.sqrt(var) + EPS
    inv = pl.reciprocal(denom, approx=True)            # EUP slot
    inv = inv * (2.0 - denom * inv)                    # one Newton step -> f32 accuracy
    xc = (x - mean) * inv                              # gamma/beta already folded into w1'/b1'

    # ---- sublayer(norm(x)): position-wise FFN; dropout == identity ----
    h = jnp.dot(xc, w1_ref[...],
                precision=jax.lax.Precision.HIGHEST,
                preferred_element_type=jnp.float32) + b1_ref[...]        # (TM, D_FF)
    h = jnp.maximum(h, 0.0)
    y = jnp.dot(h, w2_ref[...],                        # natural (D_FF, D) layout, K=128
                precision=jax.lax.Precision.HIGHEST,
                preferred_element_type=jnp.float32) + b2_ref[...]        # (TM, D)

    # ---- residual against the RAW input x ----
    out_ref[...] = (x + y).astype(out_ref.dtype)
    # NOTE: output last-dim 32 (<128 lanes) -> masked stores; negligible here,
    # keep lane-dense outputs when generalizing to larger D.


def pack_params(w1, b1, w2, b2, gamma, beta):
    """Hoisted weight prep — call ONCE per weight set, never per forward."""
    w1p = gamma[:, None] * w1                          # fold LN scale into Linear-1
    b1p = (b1 + beta @ w1).reshape(1, -1)              # fold LN shift into bias-1
    return w1p, b1p, w2, b2.reshape(1, -1)


def sublayer_connection(x, packed, *, tm=256):
    """x: (B, S, D). `packed` from pack_params(). Row-tiled, 'parallel' grid."""
    w1p, b1p, w2, b2r = packed
    B, S, D = x.shape
    d_ff = w1p.shape[1]
    rows = B * S
    x2 = x.reshape(rows, D)

    # Row tile: multiple of 8 sublanes; pad rows so the grid divides evenly.
    tm = min(tm, pl.cdiv(rows, 8) * 8)
    rows_p = pl.cdiv(rows, tm) * tm
    if rows_p != rows:
        x2 = jnp.pad(x2, ((0, rows_p - rows), (0, 0)))

    out = pl.pallas_call(
        _sublayer_kernel,
        out_shape=jax.ShapeDtypeStruct((rows_p, D), x.dtype),
        grid=(rows_p // tm,),
        in_specs=[
            pl.BlockSpec((tm, D), lambda i: (i, 0)),        # x row tile
            pl.BlockSpec((D, d_ff), lambda i: (0, 0)),      # w1' (resident across grid)
            pl.BlockSpec((1, d_ff), lambda i: (0, 0)),      # b1'
            pl.BlockSpec((d_ff, D), lambda i: (0, 0)),      # w2 (natural layout)
            pl.BlockSpec((1, D), lambda i: (0, 0)),         # b2
        ],
        out_specs=pl.BlockSpec((tm, D), lambda i: (i, 0)),
        compiler_params=pltpu.CompilerParams(
            dimension_semantics=("parallel",)),             # megacore / v7x 2-TC sharding
    )(x2, w1p, b1p, w2, b2r)

    return out[:rows].reshape(B, S, D)


# ---------------- pure-JAX reference (silent sanity check) ----------------
def _ref(x, w1, b1, w2, b2, gamma, beta):
    n = x.shape[-1]
    m = jnp.mean(x, -1, keepdims=True)
    v = jnp.sum((x - m) ** 2, -1, keepdims=True) / (n - 1)
    x_ln = gamma * (x - m) / (jnp.sqrt(v) + EPS) + beta
    h = jnp.maximum(x_ln @ w1 + b1, 0.0)
    return x + (h @ w2 + b2)


if __name__ == "__main__":
    key = jax.random.PRNGKey(0)
    kx, k1, k2, k3, k4, k5, k6 = jax.random.split(key, 7)
    x = jax.random.normal(kx, (BATCH, SEQ, D_MODEL), jnp.float32)
    w1 = jax.random.normal(k1, (D_MODEL, D_FF), jnp.float32) * 0.05
    b1 = jax.random.normal(k2, (D_FF,), jnp.float32) * 0.01
    w2 = jax.random.normal(k3, (D_FF, D_MODEL), jnp.float32) * 0.05
    b2 = jax.random.normal(k4, (D_MODEL,), jnp.float32) * 0.01
    gamma = 1.0 + 0.1 * jax.random.normal(k5, (D_MODEL,), jnp.float32)
    beta = 0.1 * jax.random.normal(k6, (D_MODEL,), jnp.float32)

    # Weight prep hoisted out of the forward path (done once per weight set).
    packed = pack_params(w1, b1, w2, b2, gamma, beta)
    packed = tuple(jax.block_until_ready(p) for p in packed)

    out = sublayer_connection(x, packed, tm=8)   # 2-step "parallel" row grid
    out = jax.block_until_ready(out)

    ref = _ref(x, w1, b1, w2, b2, gamma, beta)
    assert out.shape == (BATCH, SEQ, D_MODEL)
    err = float(jnp.max(jnp.abs(out - ref)))
    assert jnp.allclose(out, ref, atol=1e-4, rtol=1e-4), err
    print("KERNEL_OK")
</pallas_src>

<mosaic_0001>
module attributes {stable_mosaic.version = 11 : i64} {
  func.func @_sublayer_kernel(%arg0: i32, %arg1: memref<8x32xf32, #tpu.memory_space<vmem>>, %arg2: memref<32x128xf32, #tpu.memory_space<vmem>>, %arg3: memref<1x128xf32, #tpu.memory_space<vmem>>, %arg4: memref<128x32xf32, #tpu.memory_space<vmem>>, %arg5: memref<1x32xf32, #tpu.memory_space<vmem>>, %arg6: memref<8x32xf32, #tpu.memory_space<vmem>>) attributes {dimension_semantics = [#tpu.dimension_semantics<parallel>], iteration_bounds = array<i64: 2>, scalar_prefetch = 0 : i64, scratch_operands = 0 : i64, tpu.core_type = #tpu.core_type<tc>, window_params = [{transform_indices = @transform_0, window_bounds = array<i64: 8, 32>}, {pipeline_mode = #tpu.pipeline_mode<synchronous>, transform_indices = @transform_1, window_bounds = array<i64: 32, 128>}, {pipeline_mode = #tpu.pipeline_mode<synchronous>, transform_indices = @transform_2, window_bounds = array<i64: 1, 128>}, {pipeline_mode = #tpu.pipeline_mode<synchronous>, transform_indices = @transform_3, window_bounds = array<i64: 128, 32>}, {pipeline_mode = #tpu.pipeline_mode<synchronous>, transform_indices = @transform_4, window_bounds = array<i64: 1, 32>}, {transform_indices = @transform_5, window_bounds = array<i64: 8, 32>}]} {
    %c0 = arith.constant 0 : index
    %c0_0 = arith.constant 0 : index
    %0 = vector.load %arg1[%c0, %c0_0] : memref<8x32xf32, #tpu.memory_space<vmem>>, vector<8x32xf32>
    %cst = arith.constant dense<0.000000e+00> : vector<8xf32>
    %1 = vector.multi_reduction <add>, %0, %cst [1] : vector<8x32xf32> to vector<8xf32>
    %2 = vector.shape_cast %1 : vector<8xf32> to vector<8x1xf32>
    %3 = arith.mulf %0, %0 : vector<8x32xf32>
    %cst_1 = arith.constant dense<0.000000e+00> : vector<8xf32>
    %4 = vector.multi_reduction <add>, %3, %cst_1 [1] : vector<8x32xf32> to vector<8xf32>
    %5 = vector.shape_cast %4 : vector<8xf32> to vector<8x1xf32>
    %cst_2 = arith.constant 3.125000e-02 : f32
    %6 = vector.broadcast %cst_2 : f32 to vector<8x1xf32>
    %7 = arith.mulf %2, %6 : vector<8x1xf32>
    %8 = arith.mulf %2, %7 : vector<8x1xf32>
    %9 = arith.subf %5, %8 : vector<8x1xf32>
    %cst_3 = arith.constant 0.0322580636 : f32
    %10 = vector.broadcast %cst_3 : f32 to vector<8x1xf32>
    %11 = arith.mulf %9, %10 : vector<8x1xf32>
    %12 = math.sqrt %11 : vector<8x1xf32>
    %cst_4 = arith.constant 9.99999997E-7 : f32
    %13 = vector.broadcast %cst_4 : f32 to vector<8x1xf32>
    %14 = arith.addf %12, %13 : vector<8x1xf32>
    %15 = tpu.reciprocal %14 {approx = true} : vector<8x1xf32> -> vector<8x1xf32>
    %16 = arith.mulf %14, %15 : vector<8x1xf32>
    %cst_5 = arith.constant 2.000000e+00 : f32
    %17 = vector.broadcast %cst_5 : f32 to vector<8x1xf32>
    %18 = arith.subf %17, %16 : vector<8x1xf32>
    %19 = arith.mulf %15, %18 : vector<8x1xf32>
    %20 = vector.broadcast %7 : vector<8x1xf32> to vector<8x32xf32>
    %21 = arith.subf %0, %20 : vector<8x32xf32>
    %22 = vector.broadcast %19 : vector<8x1xf32> to vector<8x32xf32>
    %23 = arith.mulf %21, %22 : vector<8x32xf32>
    %c0_6 = arith.constant 0 : index
    %c0_7 = arith.constant 0 : index
    %24 = vector.load %arg2[%c0_6, %c0_7] : memref<32x128xf32, #tpu.memory_space<vmem>>, vector<32x128xf32>
    %cst_8 = arith.constant dense<0.000000e+00> : vector<8x128xf32>
    %25 = tpu.matmul %23, %24, %cst_8 {dimension_numbers = #tpu.dot_dimension_numbers<[1], [0], [0], [1], [0, 0, 1, 1], [], []>, precision = #tpu.contract_precision<fp32>} : vector<8x32xf32>, vector<32x128xf32>, vector<8x128xf32> -> vector<8x128xf32>
    %c0_9 = arith.constant 0 : index
    %c0_10 = arith.constant 0 : index
    %26 = vector.load %arg3[%c0_9, %c0_10] : memref<1x128xf32, #tpu.memory_space<vmem>>, vector<1x128xf32>
    %27 = vector.broadcast %26 : vector<1x128xf32> to vector<8x128xf32>
    %28 = arith.addf %25, %27 : vector<8x128xf32>
    %cst_11 = arith.constant 0.000000e+00 : f32
    %29 = vector.broadcast %cst_11 : f32 to vector<8x128xf32>
    %30 = arith.maximumf %28, %29 : vector<8x128xf32>
    %c0_12 = arith.constant 0 : index
    %c0_13 = arith.constant 0 : index
    %31 = vector.load %arg4[%c0_12, %c0_13] : memref<128x32xf32, #tpu.memory_space<vmem>>, vector<128x32xf32>
    %cst_14 = arith.constant dense<0.000000e+00> : vector<8x32xf32>
    %32 = tpu.matmul %30, %31, %cst_14 {dimension_numbers = #tpu.dot_dimension_numbers<[1], [0], [0], [1], [0, 0, 1, 1], [], []>, precision = #tpu.contract_precision<fp32>} : vector<8x128xf32>, vector<128x32xf32>, vector<8x32xf32> -> vector<8x32xf32>
    %c0_15 = arith.constant 0 : index
    %c0_16 = arith.constant 0 : index
    %33 = vector.load %arg5[%c0_15, %c0_16] : memref<1x32xf32, #tpu.memory_space<vmem>>, vector<1x32xf32>
    %34 = vector.broadcast %33 : vector<1x32xf32> to vector<8x32xf32>
    %35 = arith.addf %32, %34 : vector<8x32xf32>
    %36 = arith.addf %0, %35 : vector<8x32xf32>
    %c0_17 = arith.constant 0 : index
    %c0_18 = arith.constant 0 : index
    %37 = vector.load %arg6[%c0_17, %c0_18] : memref<8x32xf32, #tpu.memory_space<vmem>>, vector<8x32xf32>
    tpu.vector_store %arg6[%c0_17, %c0_18], %36 {strides = array<i32>} : memref<8x32xf32, #tpu.memory_space<vmem>>, vector<8x32xf32>,
    return
  }
  func.func @transform_0(%arg0: i32) -> (i32, i32) {
    %c0_i32 = arith.constant 0 : i32
    %c0_i32_0 = arith.constant 0 : i32
    return %arg0, %c0_i32 : i32, i32
  }
  func.func @transform_1(%arg0: i32) -> (i32, i32) {
    %c0_i32 = arith.constant 0 : i32
    %c0_i32_0 = arith.constant 0 : i32
    %c0_i32_1 = arith.constant 0 : i32
    return %c0_i32, %c0_i32_0 : i32, i32
  }
  func.func @transform_2(%arg0: i32) -> (i32, i32) {
    %c0_i32 = arith.constant 0 : i32
    %c0_i32_0 = arith.constant 0 : i32
    %c0_i32_1 = arith.constant 0 : i32
    return %c0_i32, %c0_i32_0 : i32, i32
  }
  func.func @transform_3(%arg0: i32) -> (i32, i32) {
    %c0_i32 = arith.constant 0 : i32
    %c0_i32_0 = arith.constant 0 : i32
    %c0_i32_1 = arith.constant 0 : i32
    return %c0_i32, %c0_i32_0 : i32, i32
  }
  func.func @transform_4(%arg0: i32) -> (i32, i32) {
    %c0_i32 = arith.constant 0 : i32
    %c0_i32_0 = arith.constant 0 : i32
    %c0_i32_1 = arith.constant 0 : i32
    return %c0_i32, %c0_i32_0 : i32, i32
  }
  func.func @transform_5(%arg0: i32) -> (i32, i32) {
    %c0_i32 = arith.constant 0 : i32
    %c0_i32_0 = arith.constant 0 : i32
    return %arg0, %c0_i32 : i32, i32
  }
}

</mosaic_0001>

<bundles_post_ra>
// kernel: tpu_custom_call.1
= control target key start
LH: loop header
LB: loop body
LE: loop exit
PB: predicated region body
PF: predicated region fallthrough
CT: control target
= control target key end

     0   :  { %10 = vsyncpa [#allocation3], 0  ;;  %s2665_s0 = inlined_call_operand.vmem [shape: f32[16,32], index: 0, kind: input, shape index: {}]   ;;  %s2666_s1 = inlined_call_operand.vmem [shape: f32[32,128], index: 1, kind: input, shape index: {}]   ;;  %s2667_s2 = inlined_call_operand.vmem [shape: f32[1,128], index: 2, kind: input, shape index: {}]   ;;  %s2668_s3 = inlined_call_operand.vmem [shape: f32[128,32], index: 3, kind: input, shape index: {}]   ;;  %s2669_s4 = inlined_call_operand.vmem [shape: f32[1,32], index: 4, kind: input, shape index: {}]   ;;  %s2670_s5 = inlined_call_operand.hbm [shape: f32[16,32], index: 5, kind: output, shape index: {}]  }
   0x1   :  { %12 = vsyncpa [#allocation3 + $0x1], 0  ;;  %s2046_s18 = smov 0   ;;  %s2048_s19 = smov 0  }
   0x2   :  { %s2050_s20 = smov 0   ;;  %s2052_s21 = smov 0  }
   0x3 LB: > { %s2067_s22 = sadd.s32 4294967295, %s2011_s21   ;;  %s1486_s23 = sadd.s32 4294967294, %s2011_s21   ;;  %s2011_s21 = sphi %s2052_s21, %s2688_s21   ;;  %s2007_s20 = sphi %s2050_s20, %s2687_s20   ;;  %s2003_s19 = sphi %s2048_s19, %s2686_s19   ;;  %s1999_s18 = sphi %s2046_s18, %s2685_s18  }
   0x4   : > { %s2071_s24 = sadd.s32 1, %s2011_s21   ;;  %s135_s25 = sadd.s32 1, %s2007_s20 }
   0x5   : > { %s132_s26 = ssub.s32 %s2011_s21, %s2071_s24  ;;  %p145_p0 = scmp.ne.s32.totalorder %s2007_s20, %s2003_s19 }
   0x6   : > { %p133_p1 = scmp.eq.s32.totalorder %s132_s26, 0  ;;  %p146_p2 = scmp.eq.s32.totalorder %s2067_s22, 1 }
   0x7   : > { %p151_p3 = scmp.ne.s32.totalorder %s2003_s19, %s1999_s18  ;;  %p152_p4 = scmp.eq.s32.totalorder %s1486_s23, 1 }
   0x8   : > { %s2082_s27 = scalar_select %p133_p1, %s2007_s20, %s135_s25  }
   0x9   : > { %p2084_p5 = por %p146_p2, %p145_p0  ;;  %p2088_p6 = por %p152_p4, %p151_p3 }
   0xa   : > { %p1489_p7 = scmp.ge.s32.totalorder %s2011_s21, 1  ;;  %p189_p8 = scmp.lt.s32.totalorder %s2011_s21, 3 }
   0xc   : > { %p190_p9 = pnand %p1489_p7, %p189_p8 }
   0xd   : > { %p216_p10 = scmp.lt.s32.totalorder (!%p190_p9), %s2067_s22, 1  ;;  %s1495_s8 = sshll.u32 (!%p190_p9), %s2067_s22, 7 }
   0xe   : > { %193 = sbr.rel (%p190_p9) target bundleno = 729 (0x2d9), region = 40  ;;  %s1425_s13 = scalar_lea.hbm (!%p190_p9), %s2670_s5, %s1495_s8 }
   0xf   : > { %s2015_s16 = smov (!%p190_p9), [#allocation2]  }
  0x13   : > { %s217_s30 = scalar_select %p216_p10, %s2067_s22, 1  ;;  %vm221_vm0 = vcmask 261120   ;;  %v250_v4 = vld [vmem:[%s2666_s1 + $0x18] sm:$0xff]  ;;  %v249_v5 = vld [vmem:[%s2666_s1 + $0x10] sm:$0xff]  ;;  %v248_v6 = vld [vmem:[%s2666_s1 + $0x8] sm:$0xff]  ;;  %v2013_v7 = vmov 0.0  }
  0x14   : > { %1641 = vmatprep.subr.mxu1 %v2013_v7  ;;  %v2116_v8 = vand.u32 4294901760, %v250_v4  ;;  %v2118_v9 = vand.u32 4294901760, %v249_v5  ;;  %v2120_v10 = vand.u32 4294901760, %v248_v6  ;;  %v247_v11 = vld [vmem:[%s2666_s1] sm:$0xff]  ;;  %1630 = vmatprep.subr.mxu0 %v2013_v7  ;;  %vm2014_vm1 = vmmov 0   ;;  %v762_v53 = vld [vmem:[%s2668_s3 + $0x78] sm:$0xff] }
  0x15   : > { %s1491_s6 = sshll.u32 %s217_s30, 3  ;;  %v2126_v12 = vand.u32 4294901760, %v247_v11  ;;  %1649 = vmatprep.mubr.msk.f32.mxu1 %vm2014_vm1, %v2013_v7  ;;  %1638 = vmatprep.mubr.msk.f32.mxu0 %vm2014_vm1, %v2013_v7  ;;  %v2225_v54 = vand.u32 4294901760, %v762_v53  ;;  %v761_v55 = vld [vmem:[%s2668_s3 + $0x70] sm:$0xff]  ;;  %v760_v58 = vld [vmem:[%s2668_s3 + $0x68] sm:$0xff]  ;;  %v759_v62 = vld [vmem:[%s2668_s3 + $0x60] sm:$0xff] }
  0x16   : > { %s219_s9 = scalar_lea.vmem %s2665_s0, %s1491_s6  ;;  %v2133_v13 = vsub.f32 %v250_v4, %v2116_v8  ;;  %v2136_v14 = vsub.f32 %v249_v5, %v2118_v9  ;;  %v2139_v15 = vsub.f32 %v248_v6, %v2120_v10  ;;  %1631 = vmatpush3.msra.mxu0 %v2116_v8  ;;  %v2233_v57 = vand.u32 4294901760, %v761_v55  ;;  %v758_v4 = vld [vmem:[%s2668_s3 + $0x58] sm:$0xff]  ;;  %s213_s6 = sand.u32 1, %s2003_s19  }
  0x17   : > { %v2099_v0 = vld [vmem:[%s219_s9] sm:$0xff]  ;;  %v2143_v16 = vsub.f32 %v247_v11, %v2126_v12  ;;  %1632 = vmatprep.subr.mxu0 %v2013_v7  ;;  %v2231_v56 = vsub.f32 %v762_v53, %v2225_v54  ;;  %v2244_v61 = vand.u32 4294901760, %v760_v58  ;;  %v757_v11 = vld [vmem:[%s2668_s3 + $0x50] sm:$0xff]  ;;  %v750_v53 = vld [vmem:[%s2668_s3 + $0x18] sm:$0xff]  ;;  %s1490_s7 = sshll.u32 %s213_s6, 3  ;;  %s1414_s14 = scalar_lea.sflag [#allocation3], %s213_s6 }
  0x18   : > { %v222_v1 = vsel %vm221_vm0, %v2099_v0, 0.0  ;;  %v225_v2 = vmul.f32 %v2099_v0, %v2099_v0  ;;  %v367_v17 = vand.u32 4294901760, %v2133_v13  ;;  %v374_v18 = vand.u32 4294901760, %v2136_v14  ;;  %1633 = vmatpush3.msra.mxu0 %v2118_v9  ;;  %s215_s9 = scalar_lea.vmem [#allocation2], %s1490_s7  ;;  %s1955_s22 = sshll.u32 %s2015_s16, 4  ;;  %s1956_s22 = int_to_ptr.vmem [resolvable:$false] %s1955_s22 }
  0x19   : > { %223 = vadd.xlane.f32.xlu0 %v222_v1  ;;  %v381_v19 = vand.u32 4294901760, %v2139_v15  ;;  %v388_v20 = vand.u32 4294901760, %v2143_v16  ;;  %1634 = vmatprep.subr.mxu0 %v2013_v7  ;;  %v864_v59 = vand.u32 4294901760, %v2231_v56  ;;  %v2242_v60 = vsub.f32 %v761_v55, %v2233_v57  ;;  %s1427_s10 = sshll.u32 %s215_s9, 4  ;;  %s1957_s17 = scalar_lea.vmem %s1956_s22, 256  ;;  %s1428_s10 = int_to_ptr.vmem [resolvable:$true] %s1427_s10 }
  0x1a   : > { %v226_v3 = vsel %vm221_vm0, %v225_v2, 0.0  ;;  %v368_v21 = vsub.f32 %v2133_v13, %v367_v17  ;;  %v375_v22 = vsub.f32 %v2136_v14, %v374_v18  ;;  %1635 = vmatpush3.msra.mxu0 %v2120_v10  ;;  %v2256_v2 = vsub.f32 %v760_v58, %v2244_v61  ;;  %s1951_s15 = scalar_lea.vmem %s1428_s10, 128  ;;  %p1958_p0 = scmp.lt.s32.totalorder %s1428_s10, %s1956_s22 }
  0x1b   : > { %v382_v23 = vsub.f32 %v2139_v15, %v381_v19  ;;  %1636 = vmatprep.subr.mxu0 %v2013_v7  ;;  %v389_v26 = vsub.f32 %v2143_v16, %v388_v20  ;;  %v865_v63 = vsub.f32 %v2231_v56, %v864_v59  ;;  %v871_v1 = vand.u32 4294901760, %v2242_v60  ;;  %p1952_p11 = scmp.ne.s32.totalorder %s1428_s10, %s1951_s15  ;;  %p1959_p1 = scmp.lt.s32.totalorder %s1957_s17, %s1951_s15 }
  0x1c   : > { %v369_v24 = vand.u32 4294901760, %v368_v21  ;;  %v376_v25 = vand.u32 4294901760, %v375_v22  ;;  %1637 = vmatpush3.msra.mxu0 %v2126_v12 }
  0x1d   : > { %227 = vadd.xlane.f32.xlu0 %v226_v3  ;;  %1652 = vmatprep.subr.mxu0 %v2013_v7  ;;  %v383_v27 = vand.u32 4294901760, %v382_v23  ;;  %v390_v28 = vand.u32 4294901760, %v389_v26  ;;  %v2258_v3 = vand.u32 4294901760, %v759_v62  ;;  %v866_v5 = vand.u32 4294901760, %v865_v63  ;;  %v755_v23 = vld [vmem:[%s2668_s3 + $0x40] sm:$0xff]  ;;  %p1953_p12 = pnand %p1952_p11, %p2084_p5  ;;  %p1960_p2 = por %p1959_p1, %p1958_p0 }
  0x1e   : > { %1642 = vmatpush3.msra.mxu1 %v369_v24  ;;  %v872_v6 = vsub.f32 %v2242_v60, %v871_v1  ;;  %v2387_v63 = vand.u32 4294901760, %v750_v53 }
  0x1f   : > { %1643 = vmatprep.subr.mxu1 %v2013_v7  ;;  %p1954_p13 = pneg %p1953_p12 }
  0x20   : > { %1644 = vmatpush3.msra.mxu1 %v376_v25 }
  0x21   : > { %1645 = vmatprep.subr.mxu1 %v2013_v7  ;;  %p1961_p3 = pnand %p1960_p2, %p1954_p13 }
  0x22   : > { %1646 = vmatpush3.msra.mxu1 %v383_v27  ;;  %v2312_v27 = vand.u32 4294901760, %v755_v23 }
  0x23   : > { %1647 = vmatprep.subr.mxu1 %v2013_v7 }
  0x24   : > { %1648 = vmatpush3.msra.mxu1 %v390_v28 }
  0x25   : > { %1663 = vmatprep.subr.mxu1 %v2013_v7 }
  0xa2   : > { %v224_v29 = vpop.xlane.xlu0 %223 }
  0xa3   : > { %v229_v30 = vmul.f32 0.03125, %v224_v29 }
  0xa5   : > { %v230_v31 = vmul.f32 %v229_v30, %v224_v29  ;;  %v245_v44 = vsub.f32 %v2099_v0, %v229_v30  ;;  %v754_v29 = vld [vmem:[%s2668_s3 + $0x38] sm:$0xff] }
  0xa6   : > { %v228_v32 = vpop.xlane.xlu0 %227 }
  0xa7   : > { %v231_v33 = vsub.f32 %v228_v32, %v230_v31  ;;  %v2328_v32 = vsub.f32 %v755_v23, %v2312_v27 }
  0xa9   : > { %v232_v34 = vmul.f32 0.032258064, %v231_v33  ;;  %v2330_v33 = vand.u32 4294901760, %v754_v29 }
  0xab   : > { %1947 = vrsqrt.f32 %v232_v34  ;;  %vm235_vm2 = vcmp.eq.f32.partialorder %v232_v34, inf  ;;  %v238_v37 = vand.u32 2147483648, %v232_v34  ;;  %vm237_vm3 = vcmp.eq.f32.partialorder %v232_v34, 0.0 }
  0xb8   : > { %v1948_v35 = vpop.eup %1947 }
  0xb9   : > { %v234_v36 = vmul.f32 %v1948_v35, %v232_v34  ;;  %v753_v35 = vld [vmem:[%s2668_s3 + $0x30] sm:$0xff] }
  0xbb   : > { %v236_v38 = vsel %vm235_vm2, %v232_v34, %v234_v36 }
  0xbc   : > { %v239_v39 = vsel %vm237_vm3, %v238_v37, %v236_v38  ;;  %v913_v38 = vand.u32 4294901760, %v2328_v32 }
  0xbd   : > { %v240_v40 = vadd.f32 1e-06, %v239_v39  ;;  %v2343_v39 = vsub.f32 %v754_v29, %v2330_v33 }
  0xbf   : > { %1949 = vrcp.f32 %v240_v40 }
  0xcc   : > { %v1950_v41 = vpop.eup %1949 }
  0xcd   : > { %v242_v42 = vmul.f32 %v1950_v41, %v240_v40  ;;  %v2346_v40 = vand.u32 4294901760, %v753_v35 }
  0xcf   : > { %v243_v43 = vsub.f32 2.0, %v242_v42 }
  0xd1   : > { %v244_v45 = vmul.f32 %v1950_v41, %v243_v43  ;;  %v752_v41 = vld [vmem:[%s2668_s3 + $0x28] sm:$0xff]  ;;  %v914_v43 = vsub.f32 %v2328_v32, %v913_v38 }
  0xd3   : > { %v246_v46 = vmul.f32 %v245_v44, %v244_v45  ;;  %v920_v44 = vand.u32 4294901760, %v2343_v39  ;;  %v2357_v45 = vand.u32 4294901760, %v752_v41 }
  0xd5   : > { %v259_v47 = vsel %vm221_vm0, %v246_v46, 0  ;;  %v2361_v46 = vsub.f32 %v753_v35, %v2346_v40 }
  0xd6   : > { %v330_v48 = vand.u32 4294901760, %v259_v47 }
  0xd8   : > { %v331_v49 = vsub.f32 %v259_v47, %v330_v48  ;;  %1650 = vmatmul.mubr.f32.vlgmr.msra.gmra.mxu1 %v330_v48  ;;  %v751_v47 = vld [vmem:[%s2668_s3 + $0x20] sm:$0xff] }
  0xd9   : > { %1664 = vmatpush3.msra.mxu1 %v2116_v8  ;;  %1671 = vmatprep.mubr.msk.f32.mxu1 %vm2014_vm1, %v2013_v7 }
  0xda   : > { %1665 = vmatprep.subr.mxu1 %v2013_v7  ;;  %v332_v50 = vand.u32 4294901760, %v331_v49 }
  0xdb   : > { %1666 = vmatpush3.msra.mxu1 %v2118_v9 }
  0xdc   : > { %1667 = vmatprep.subr.mxu1 %v2013_v7  ;;  %v333_v51 = vsub.f32 %v331_v49, %v332_v50 }
  0xdd   : > { %1668 = vmatpush3.msra.mxu1 %v2120_v10 }
  0xde   : > { %1669 = vmatprep.subr.mxu1 %v2013_v7  ;;  %v334_v52 = vand.u32 4294901760, %v333_v51  ;;  %v2374_v51 = vand.u32 4294901760, %v751_v47 }
  0xdf   : > { %1670 = vmatpush3.msra.mxu1 %v2126_v12 }
  0xe0   : > { %1672 = vmatmul.mubr.f32.vlgmr.msra.gmra.mxu1 %v332_v50  ;;  %1685 = vmatprep.subr.mxu1 %v2013_v7  ;;  %v2372_v50 = vsub.f32 %v752_v41, %v2357_v45 }
  0xe1   : > { %1639 = vmatmul.mubr.f32.vlgmr.msra.gmra.mxu0 %v334_v52  ;;  %1686 = vmatpush3.msra.mxu1 %v2116_v8  ;;  %v878_v8 = vand.u32 4294901760, %v2256_v2  ;;  %v927_v52 = vand.u32 4294901760, %v2361_v46 }
  0xe2   : > { %1653 = vmatpush3.msra.mxu0 %v2133_v13  ;;  %1687 = vmatprep.subr.mxu1 %v2013_v7  ;;  %v2676_v58 = vand.u32 4294901760, %v2372_v50 }
  0xe3   : > { %1654 = vmatprep.subr.mxu0 %v2013_v7  ;;  %1688 = vmatpush3.msra.mxu1 %v2118_v9  ;;  %v2270_v9 = vsub.f32 %v759_v62, %v2258_v3  ;;  %v879_v13 = vsub.f32 %v2256_v2, %v878_v8  ;;  %v2385_v62 = vsub.f32 %v751_v47, %v2374_v51 }
  0xe4   : > { %1655 = vmatpush3.msra.mxu0 %v2136_v14  ;;  %1689 = vmatprep.subr.mxu1 %v2013_v7 }
  0xe5   : > { %1656 = vmatprep.subr.mxu0 %v2013_v7  ;;  %1690 = vmatpush3.msra.mxu1 %v2120_v10  ;;  %v2273_v10 = vand.u32 4294901760, %v758_v4  ;;  %v885_v14 = vand.u32 4294901760, %v2270_v9 }
  0xe6   : > { %1657 = vmatpush3.msra.mxu0 %v2139_v15  ;;  %1691 = vmatprep.subr.mxu1 %v2013_v7  ;;  %v2283_v15 = vand.u32 4294901760, %v757_v11 }
  0xe7   : > { %1658 = vmatprep.subr.mxu0 %v2013_v7  ;;  %1660 = vmatprep.mubr.msk.f32.mxu0 %vm2014_vm1, %v2013_v7 }
  0xe8   : > { %1659 = vmatpush3.msra.mxu0 %v2143_v16  ;;  %1692 = vmatpush3.msra.mxu1 %v2126_v12  ;;  %v873_v12 = vand.u32 4294901760, %v872_v6  ;;  %v2287_v16 = vsub.f32 %v758_v4, %v2273_v10  ;;  %v928_v4 = vsub.f32 %v2361_v46, %v927_v52  ;;  %v935_v6 = vsub.f32 %v2372_v50, %v2676_v58 }
  0xe9   : > { %1693 = vmatprep.mubr.msk.f32.mxu1 %vm2014_vm1, %v2013_v7  ;;  %1661 = vmatmul.mubr.f32.vlgmr.msra.gmra.mxu0 %v331_v49  ;;  %v921_v49 = vsub.f32 %v2343_v39, %v920_v44 }
  0xea   : > { %1674 = vmatprep.subr.mxu0 %v2013_v7  ;;  %1694 = vmatmul.mubr.f32.vlgmr.msra.gmra.mxu1 %v330_v48  ;;  %v892_v22 = vand.u32 4294901760, %v2287_v16 }
  0xeb   : > { %1675 = vmatpush3.msra.mxu0 %v367_v17  ;;  %1682 = vmatprep.mubr.msk.f32.mxu0 %vm2014_vm1, %v2013_v7  ;;  %v756_v17 = vld [vmem:[%s2668_s3 + $0x48] sm:$0xff]  ;;  %v922_v55 = vand.u32 4294901760, %v921_v49 }
  0xec   : > { %1676 = vmatprep.subr.mxu0 %v2013_v7  ;;  %1731 = vmatprep.subr.mxu1 %v2013_v7  ;;  %v2299_v21 = vand.u32 4294901760, %v756_v17  ;;  %v893_v28 = vsub.f32 %v2287_v16, %v892_v22 }
  0xed   : > { %1677 = vmatpush3.msra.mxu0 %v374_v18  ;;  %1763 = vmatprep.mubr.msk.f32.mxu1 %vm2014_vm1, %v2013_v7  ;;  %v880_v18 = vand.u32 4294901760, %v879_v13 }
  0xee   : > { %1678 = vmatprep.subr.mxu0 %v2013_v7  ;;  %1732 = vmatpush3.msra.mxu1 %v866_v5  ;;  %v2310_v26 = vsub.f32 %v756_v17, %v2299_v21  ;;  %v894_v34 = vand.u32 4294901760, %v893_v28  ;;  %v749_v5 = vld [vmem:[%s2668_s3 + $0x10] sm:$0xff]  ;;  %v929_v17 = vand.u32 4294901760, %v928_v4 }
  0xef   : > { %1679 = vmatpush3.msra.mxu0 %v381_v19  ;;  %1733 = vmatprep.subr.mxu1 %v2013_v7  ;;  %v886_v19 = vsub.f32 %v2270_v9, %v885_v14  ;;  %v2405_v13 = vand.u32 4294901760, %v749_v5 }
  0xf0   : > { %1680 = vmatprep.subr.mxu0 %v2013_v7  ;;  %1734 = vmatpush3.msra.mxu1 %v873_v12  ;;  %v906_v31 = vand.u32 4294901760, %v2310_v26  ;;  %v2403_v12 = vsub.f32 %v750_v53, %v2387_v63 }
  0xf1   : > { %1681 = vmatpush3.msra.mxu0 %v388_v20  ;;  %v2297_v20 = vsub.f32 %v757_v11, %v2283_v15  ;;  %1735 = vmatprep.subr.mxu1 %v2013_v7  ;;  %v887_v24 = vand.u32 4294901760, %v886_v19  ;;  %v2675_v11 = vand.u32 4294901760, %v2385_v62  ;;  %v936_v19 = vand.u32 4294901760, %v935_v6 }
  0xf2   : > { %1683 = vmatmul.mubr.f32.vlgmr.msra.gmra.mxu0 %v330_v48  ;;  %1696 = vmatprep.subr.mxu0 %v2013_v7  ;;  %v907_v37 = vsub.f32 %v2310_v26, %v906_v31  ;;  %v915_v48 = vand.u32 4294901760, %v914_v43  ;;  %v2418_v28 = vsub.f32 %v749_v5, %v2405_v13 }
  0xf3   : > { %1728 = vmatprep.mubr.msk.f32.mxu0 %vm2014_vm1, %v2013_v7  ;;  %1697 = vmatpush3.msra.mxu0 %v2225_v54  ;;  %v899_v25 = vand.u32 4294901760, %v2297_v20  ;;  %v942_v23 = vsub.f32 %v2385_v62, %v2675_v11 }
  0xf4   : > { %1698 = vmatprep.subr.mxu0 %v2013_v7  ;;  %1736 = vmatpush3.msra.mxu1 %v880_v18  ;;  %v908_v42 = vand.u32 4294901760, %v907_v37  ;;  %v748_v18 = vld [vmem:[%s2668_s3 + $0x8] sm:$0xff] }
  0xf5   : > { %1699 = vmatpush3.msra.mxu0 %v2233_v57  ;;  %1737 = vmatprep.subr.mxu1 %v2013_v7  ;;  %v900_v30 = vsub.f32 %v2297_v20, %v899_v25  ;;  %v2421_v29 = vand.u32 4294901760, %v748_v18 }
  0xf6   : > { %1700 = vmatprep.subr.mxu0 %v2013_v7  ;;  %1738 = vmatpush3.msra.mxu1 %v887_v24  ;;  %v2674_v24 = vand.u32 4294901760, %v2403_v12 }
  0xf7   : > { %1701 = vmatpush3.msra.mxu0 %v2244_v61  ;;  %1739 = vmatprep.subr.mxu1 %v2013_v7  ;;  %v901_v36 = vand.u32 4294901760, %v900_v30  ;;  %v747_v30 = vld [vmem:[%s2668_s3] sm:$0xff]  ;;  %v2436_v41 = vsub.f32 %v748_v18, %v2421_v29 }
  0xf8   : > { %1702 = vmatprep.subr.mxu0 %v2013_v7  ;;  %1740 = vmatpush3.msra.mxu1 %v894_v34  ;;  %v943_v34 = vand.u32 4294901760, %v942_v23  ;;  %v949_v35 = vsub.f32 %v2403_v12, %v2674_v24  ;;  %v2432_v37 = vand.u32 4294901760, %v747_v30 }
  0xf9   : > { %1703 = vmatpush3.msra.mxu0 %v2258_v3  ;;  %1741 = vmatprep.subr.mxu1 %v2013_v7 }
  0xfa   : > { %1704 = vmatprep.subr.mxu0 %v2013_v7  ;;  %1742 = vmatpush3.msra.mxu1 %v901_v36  ;;  %v2673_v36 = vand.u32 4294901760, %v2418_v28  ;;  %v2444_v47 = vsub.f32 %v747_v30, %v2432_v37 }
  0xfb   : > { %1705 = vmatpush3.msra.mxu0 %v2273_v10  ;;  %1743 = vmatprep.subr.mxu1 %v2013_v7 }
  0xfc   : > { %1706 = vmatprep.subr.mxu0 %v2013_v7  ;;  %1744 = vmatpush3.msra.mxu1 %v908_v42  ;;  %v950_v42 = vand.u32 4294901760, %v949_v35  ;;  %v956_v43 = vsub.f32 %v2418_v28, %v2673_v36  ;;  %v2671_v53 = vand.u32 4294901760, %v2444_v47  ;;  %v1492_v35 = vld [vmem:[%s2667_s2] ss:$0 sm:$0xff] }
  0xfd   : > { %1707 = vmatpush3.msra.mxu0 %v2283_v15  ;;  %1745 = vmatprep.subr.mxu1 %v2013_v7 }
  0xfe   : > { %1708 = vmatprep.subr.mxu0 %v2013_v7  ;;  %1746 = vmatpush3.msra.mxu1 %v915_v48  ;;  %v2672_v48 = vand.u32 4294901760, %v2436_v41  ;;  %v957_v49 = vand.u32 4294901760, %v956_v43  ;;  %v970_v4 = vsub.f32 %v2444_v47, %v2671_v53 }
  0xff   : > { %1709 = vmatpush3.msra.mxu0 %v2299_v21  ;;  %1747 = vmatprep.subr.mxu1 %v2013_v7 }
 0x100   : > { %1710 = vmatprep.subr.mxu0 %v2013_v7  ;;  %1748 = vmatpush3.msra.mxu1 %v922_v55  ;;  %v963_v55 = vsub.f32 %v2436_v41, %v2672_v48  ;;  %v971_v6 = vand.u32 4294901760, %v970_v4 }
 0x101   : > { %1711 = vmatpush3.msra.mxu0 %v2312_v27  ;;  %1749 = vmatprep.subr.mxu1 %v2013_v7 }
 0x102   : > { %1712 = vmatprep.subr.mxu0 %v2013_v7  ;;  %1750 = vmatpush3.msra.mxu1 %v929_v17  ;;  %v964_v5 = vand.u32 4294901760, %v963_v55 }
 0x103   : > { %1713 = vmatpush3.msra.mxu0 %v2330_v33  ;;  %1751 = vmatprep.subr.mxu1 %v2013_v7 }
 0x104   : > { %1714 = vmatprep.subr.mxu0 %v2013_v7  ;;  %1752 = vmatpush3.msra.mxu1 %v936_v19 }
 0x105   : > { %1715 = vmatpush3.msra.mxu0 %v2346_v40  ;;  %1753 = vmatprep.subr.mxu1 %v2013_v7 }
 0x106   : > { %1716 = vmatprep.subr.mxu0 %v2013_v7  ;;  %1754 = vmatpush3.msra.mxu1 %v943_v34 }
 0x107   : > { %1717 = vmatpush3.msra.mxu0 %v2357_v45  ;;  %1755 = vmatprep.subr.mxu1 %v2013_v7 }
 0x108   : > { %1718 = vmatprep.subr.mxu0 %v2013_v7  ;;  %1756 = vmatpush3.msra.mxu1 %v950_v42 }
 0x109   : > { %1719 = vmatpush3.msra.mxu0 %v2374_v51  ;;  %1757 = vmatprep.subr.mxu1 %v2013_v7 }
 0x10a   : > { %1720 = vmatprep.subr.mxu0 %v2013_v7  ;;  %1758 = vmatpush3.msra.mxu1 %v957_v49 }
 0x10b   : > { %1721 = vmatpush3.msra.mxu0 %v2387_v63  ;;  %1759 = vmatprep.subr.mxu1 %v2013_v7 }
 0x10c   : > { %1722 = vmatprep.subr.mxu0 %v2013_v7  ;;  %1760 = vmatpush3.msra.mxu1 %v964_v5 }
 0x10d   : > { %1723 = vmatpush3.msra.mxu0 %v2405_v13  ;;  %1761 = vmatprep.subr.mxu1 %v2013_v7 }
 0x10e   : > { %1724 = vmatprep.subr.mxu0 %v2013_v7  ;;  %1762 = vmatpush3.msra.mxu1 %v971_v6 }
 0x10f   : > { %1725 = vmatpush3.msra.mxu0 %v2421_v29  ;;  %1801 = vmatprep.subr.mxu1 %v2013_v7 }
 0x110   : > { %1726 = vmatprep.subr.mxu0 %v2013_v7 }
 0x111   : > { %1727 = vmatpush3.msra.mxu0 %v2432_v37 }
 0x112   : > { %1766 = vmatprep.subr.mxu0 %v2013_v7 }
 0x198   : > { %v427_v17 = vpop.f32.mrf.mxu1 }
 0x19a   : > { %v1651_v18 = vpop.f32.mrf.mxu1 }
 0x1a0   : > { %v584_v19 = vpop.f32.mrf.mxu1 }
 0x1a1   : > { %v336_v23 = vpop.f32.mrf.mxu0 }
 0x1a2   : > { %v1673_v30 = vpop.f32.mrf.mxu1  ;;  %v337_v42 = vadd.f32 %v1492_v35, %v336_v23 }
 0x1a3   : > { %v1640_v34 = vpop.f32.mrf.mxu0 }
 0x1a4   : > { %v428_v55 = vadd.f32 %v427_v17, %v337_v42 }
 0x1a9   : > { %v507_v43 = vpop.f32.mrf.mxu0 }
 0x1aa   : > { %v742_v49 = vpop.f32.mrf.mxu1  ;;  %v508_v53 = vadd.f32 %v507_v43, %v428_v55 }
 0x1ab   : > { %v1662_v4 = vpop.f32.mrf.mxu0 }
 0x1ac   : > { %v1695_v5 = vpop.f32.mrf.mxu1  ;;  %v585_v6 = vadd.f32 %v584_v19, %v508_v53 }
 0x1b2   : > { %v667_v48 = vpop.f32.mrf.mxu0 }
 0x1b3   : > { %v668_v36 = vadd.f32 %v667_v48, %v585_v6 }
 0x1b4   : > { %v1684_v24 = vpop.f32.mrf.mxu0 }
 0x1b5   : > { %v743_v18 = vadd.f32 %v742_v49, %v668_v36 }
 0x1b7   : > { %v746_v11 = vmax.f32 %v743_v18, 0.0 }
 0x1b9   : > { %v2465_v58 = vand.u32 4294901760, %v746_v11 }
 0x1bb   : > { %v2468_v30 = vsub.f32 %v746_v11, %v2465_v58  ;;  %1764 = vmatmul.mubr.f32.vlgmr.msra.gmra.mxu1 %v2465_v58 }
 0x1bc   : > { %1802 = vmatpush3.msra.mxu1 %v2225_v54  ;;  %1833 = vmatprep.mubr.msk.f32.mxu1 %vm2014_vm1, %v2013_v7 }
 0x1bd   : > { %v853_v17 = vand.u32 4294901760, %v2468_v30  ;;  %1803 = vmatprep.subr.mxu1 %v2013_v7 }
 0x1be   : > { %1804 = vmatpush3.msra.mxu1 %v2233_v57 }
 0x1bf   : > { %1805 = vmatprep.subr.mxu1 %v2013_v7  ;;  %v854_v24 = vsub.f32 %v2468_v30, %v853_v17 }
 0x1c0   : > { %1806 = vmatpush3.msra.mxu1 %v2244_v61 }
 0x1c1   : > { %1807 = vmatprep.subr.mxu1 %v2013_v7  ;;  %v855_v11 = vand.u32 4294901760, %v854_v24 }
 0x1c2   : > { %1808 = vmatpush3.msra.mxu1 %v2258_v3 }
 0x1c3   : > { %1809 = vmatprep.subr.mxu1 %v2013_v7  ;;  %1729 = vmatmul.mubr.f32.vlgmr.msra.gmra.mxu0 %v855_v11 }
 0x1c4   : > { %1767 = vmatpush3.msra.mxu0 %v2231_v56  ;;  %1810 = vmatpush3.msra.mxu1 %v2273_v10  ;;  %v2680_v56 = vand.u32 4294901760, %v2385_v62 }
 0x1c5   : > { %1768 = vmatprep.subr.mxu0 %v2013_v7  ;;  %1811 = vmatprep.subr.mxu1 %v2013_v7 }
 0x1c6   : > { %1769 = vmatpush3.msra.mxu0 %v2242_v60  ;;  %1812 = vmatpush3.msra.mxu1 %v2283_v15  ;;  %v2683_v60 = vand.u32 4294901760, %v2436_v41 }
 0x1c7   : > { %1770 = vmatprep.subr.mxu0 %v2013_v7  ;;  %1813 = vmatprep.subr.mxu1 %v2013_v7 }
 0x1c8   : > { %1771 = vmatpush3.msra.mxu0 %v2256_v2  ;;  %1814 = vmatpush3.msra.mxu1 %v2299_v21 }
 0x1c9   : > { %1772 = vmatprep.subr.mxu0 %v2013_v7  ;;  %1815 = vmatprep.subr.mxu1 %v2013_v7 }
 0x1ca   : > { %1773 = vmatpush3.msra.mxu0 %v2270_v9  ;;  %1816 = vmatpush3.msra.mxu1 %v2312_v27 }
 0x1cb   : > { %1774 = vmatprep.subr.mxu0 %v2013_v7  ;;  %1817 = vmatprep.subr.mxu1 %v2013_v7 }
 0x1cc   : > { %1775 = vmatpush3.msra.mxu0 %v2287_v16  ;;  %1818 = vmatpush3.msra.mxu1 %v2330_v33  ;;  %v1493_v16 = vld [vmem:[%s2669_s4] ss:$0 sm:$0xff] }
 0x1cd   : > { %1776 = vmatprep.subr.mxu0 %v2013_v7  ;;  %1819 = vmatprep.subr.mxu1 %v2013_v7 }
 0x1ce   : > { %1777 = vmatpush3.msra.mxu0 %v2297_v20  ;;  %1820 = vmatpush3.msra.mxu1 %v2346_v40 }
 0x1cf   : > { %1778 = vmatprep.subr.mxu0 %v2013_v7  ;;  %1821 = vmatprep.subr.mxu1 %v2013_v7 }
 0x1d0   : > { %1779 = vmatpush3.msra.mxu0 %v2310_v26  ;;  %1822 = vmatpush3.msra.mxu1 %v2357_v45 }
 0x1d1   : > { %1780 = vmatprep.subr.mxu0 %v2013_v7  ;;  %1823 = vmatprep.subr.mxu1 %v2013_v7 }
 0x1d2   : > { %1781 = vmatpush3.msra.mxu0 %v2328_v32  ;;  %1824 = vmatpush3.msra.mxu1 %v2374_v51 }
 0x1d3   : > { %1782 = vmatprep.subr.mxu0 %v2013_v7  ;;  %1825 = vmatprep.subr.mxu1 %v2013_v7 }
 0x1d4   : > { %1783 = vmatpush3.msra.mxu0 %v2343_v39  ;;  %1826 = vmatpush3.msra.mxu1 %v2387_v63 }
 0x1d5   : > { %1784 = vmatprep.subr.mxu0 %v2013_v7  ;;  %1827 = vmatprep.subr.mxu1 %v2013_v7 }
 0x1d6   : > { %1785 = vmatpush3.msra.mxu0 %v2361_v46  ;;  %1828 = vmatpush3.msra.mxu1 %v2405_v13 }
 0x1d7   : > { %1786 = vmatprep.subr.mxu0 %v2013_v7  ;;  %1829 = vmatprep.subr.mxu1 %v2013_v7 }
 0x1d8   : > { %1787 = vmatpush3.msra.mxu0 %v2372_v50  ;;  %1830 = vmatpush3.msra.mxu1 %v2421_v29 }
 0x1d9   : > { %1788 = vmatprep.subr.mxu0 %v2013_v7  ;;  %1831 = vmatprep.subr.mxu1 %v2013_v7 }
 0x1da   : > { %1789 = vmatpush3.msra.mxu0 %v2385_v62  ;;  %1832 = vmatpush3.msra.mxu1 %v2432_v37 }
 0x1db   : > { %1790 = vmatprep.subr.mxu0 %v2013_v7  ;;  %1834 = vmatmul.mubr.f32.vlgmr.msra.gmra.mxu1 %v853_v17 }
 0x1dc   : > { %1871 = vmatprep.subr.mxu1 %v2013_v7  ;;  %1791 = vmatpush3.msra.mxu0 %v2403_v12 }
 0x1dd   : > { %1872 = vmatpush3.msra.mxu1 %v2225_v54  ;;  %1792 = vmatprep.subr.mxu0 %v2013_v7  ;;  %v2679_v54 = vand.u32 4294901760, %v2372_v50 }
 0x1de   : > { %1873 = vmatprep.subr.mxu1 %v2013_v7  ;;  %1793 = vmatpush3.msra.mxu0 %v2418_v28 }
 0x1df   : > { %1874 = vmatpush3.msra.mxu1 %v2233_v57  ;;  %1794 = vmatprep.subr.mxu0 %v2013_v7  ;;  %v2681_v57 = vand.u32 4294901760, %v2403_v12 }
 0x1e0   : > { %1875 = vmatprep.subr.mxu1 %v2013_v7  ;;  %1795 = vmatpush3.msra.mxu0 %v2436_v41 }
 0x1e1   : > { %1876 = vmatpush3.msra.mxu1 %v2244_v61  ;;  %1796 = vmatprep.subr.mxu0 %v2013_v7  ;;  %v2684_v61 = vand.u32 4294901760, %v2444_v47 }
 0x1e2   : > { %1877 = vmatprep.subr.mxu1 %v2013_v7  ;;  %1797 = vmatpush3.msra.mxu0 %v2444_v47 }
 0x1e3   : > { %1798 = vmatprep.mubr.msk.f32.mxu0 %vm2014_vm1, %v2013_v7  ;;  %1878 = vmatpush3.msra.mxu1 %v2258_v3 }
 0x1e4   : > { %1799 = vmatmul.mubr.f32.vlgmr.msra.gmra.mxu0 %v2468_v30  ;;  %1836 = vmatprep.subr.mxu0 %v2013_v7 }
 0x1e5   : > { %1879 = vmatprep.subr.mxu1 %v2013_v7  ;;  %1837 = vmatpush3.msra.mxu0 %v864_v59  ;;  %v2682_v59 = vand.u32 4294901760, %v2418_v28 }
 0x1e6   : > { %1880 = vmatpush3.msra.mxu1 %v2273_v10  ;;  %1838 = vmatprep.subr.mxu0 %v2013_v7 }
 0x1e7   : > { %1881 = vmatprep.subr.mxu1 %v2013_v7  ;;  %1839 = vmatpush3.msra.mxu0 %v871_v1 }
 0x1e8   : > { %1882 = vmatpush3.msra.mxu1 %v2283_v15  ;;  %1840 = vmatprep.subr.mxu0 %v2013_v7 }
 0x1e9   : > { %1883 = vmatprep.subr.mxu1 %v2013_v7  ;;  %1841 = vmatpush3.msra.mxu0 %v878_v8 }
 0x1ea   : > { %1884 = vmatpush3.msra.mxu1 %v2299_v21  ;;  %1842 = vmatprep.subr.mxu0 %v2013_v7 }
 0x1eb   : > { %1885 = vmatprep.subr.mxu1 %v2013_v7  ;;  %1843 = vmatpush3.msra.mxu0 %v885_v14 }
 0x1ec   : > { %1886 = vmatpush3.msra.mxu1 %v2312_v27  ;;  %1844 = vmatprep.subr.mxu0 %v2013_v7 }
 0x1ed   : > { %1887 = vmatprep.subr.mxu1 %v2013_v7  ;;  %1845 = vmatpush3.msra.mxu0 %v892_v22 }
 0x1ee   : > { %1888 = vmatpush3.msra.mxu1 %v2330_v33  ;;  %1846 = vmatprep.subr.mxu0 %v2013_v7 }
 0x1ef   : > { %1889 = vmatprep.subr.mxu1 %v2013_v7  ;;  %1847 = vmatpush3.msra.mxu0 %v899_v25 }
 0x1f0   : > { %1890 = vmatpush3.msra.mxu1 %v2346_v40  ;;  %1848 = vmatprep.subr.mxu0 %v2013_v7 }
 0x1f1   : > { %1891 = vmatprep.subr.mxu1 %v2013_v7  ;;  %1849 = vmatpush3.msra.mxu0 %v906_v31 }
 0x1f2   : > { %1892 = vmatpush3.msra.mxu1 %v2357_v45  ;;  %1850 = vmatprep.subr.mxu0 %v2013_v7 }
 0x1f3   : > { %1893 = vmatprep.subr.mxu1 %v2013_v7  ;;  %1851 = vmatpush3.msra.mxu0 %v913_v38 }
 0x1f4   : > { %1894 = vmatpush3.msra.mxu1 %v2374_v51  ;;  %1852 = vmatprep.subr.mxu0 %v2013_v7 }
 0x1f5   : > { %1895 = vmatprep.subr.mxu1 %v2013_v7  ;;  %1853 = vmatpush3.msra.mxu0 %v920_v44 }
 0x1f6   : > { %1896 = vmatpush3.msra.mxu1 %v2387_v63  ;;  %1854 = vmatprep.subr.mxu0 %v2013_v7 }
 0x1f7   : > { %1897 = vmatprep.subr.mxu1 %v2013_v7  ;;  %1855 = vmatpush3.msra.mxu0 %v927_v52 }
 0x1f8   : > { %1898 = vmatpush3.msra.mxu1 %v2405_v13  ;;  %1856 = vmatprep.subr.mxu0 %v2013_v7 }
 0x1f9   : > { %1899 = vmatprep.subr.mxu1 %v2013_v7  ;;  %1857 = vmatpush3.msra.mxu0 %v2679_v54 }
 0x1fa   : > { %1900 = vmatpush3.msra.mxu1 %v2421_v29  ;;  %1858 = vmatprep.subr.mxu0 %v2013_v7 }
 0x1fb   : > { %1901 = vmatprep.subr.mxu1 %v2013_v7  ;;  %1859 = vmatpush3.msra.mxu0 %v2680_v56 }
 0x1fc   : > { %1902 = vmatpush3.msra.mxu1 %v2432_v37  ;;  %1903 = vmatprep.mubr.msk.f32.mxu1 %vm2014_vm1, %v2013_v7 }
 0x1fd   : > { %1860 = vmatprep.subr.mxu0 %v2013_v7  ;;  %1904 = vmatmul.mubr.f32.vlgmr.msra.gmra.mxu1 %v2465_v58 }
 0x1fe   : > { %1861 = vmatpush3.msra.mxu0 %v2681_v57  ;;  %1868 = vmatprep.mubr.msk.f32.mxu0 %vm2014_vm1, %v2013_v7 }
 0x1ff   : > { %1862 = vmatprep.subr.mxu0 %v2013_v7 }
 0x200   : > { %1863 = vmatpush3.msra.mxu0 %v2682_v59 }
 0x201   : > { %1864 = vmatprep.subr.mxu0 %v2013_v7 }
 0x202   : > { %1865 = vmatpush3.msra.mxu0 %v2683_v60 }
 0x203   : > { %1866 = vmatprep.subr.mxu0 %v2013_v7 }
 0x204   : > { %1867 = vmatpush3.msra.mxu0 %v2684_v61 }
 0x205   : > { %1869 = vmatmul.mubr.f32.vlgmr.msra.gmra.mxu0 %v2465_v58 }
 0x27b   : > { %v1008_v1 = vpop.f32.mrf.mxu1 }
 0x27d   : > { %v1765_v2 = vpop.f32.mrf.mxu1 }
 0x283   : > { %v857_v3 = vpop.f32.mrf.mxu0 }
 0x284   : > { %v858_v20 = vadd.f32 %v1493_v16, %v857_v3 }
 0x285   : > { %v1730_v8 = vpop.f32.mrf.mxu0 }
 0x286   : > { %v1009_v21 = vadd.f32 %v1008_v1, %v858_v20 }
 0x29b   : > { %v1201_v9 = vpop.f32.mrf.mxu1 }
 0x29d   : > { %v1835_v10 = vpop.f32.mrf.mxu1 }
 0x2a4   : > { %v1112_v14 = vpop.f32.mrf.mxu0 }
 0x2a5   : > { %v1113_v25 = vadd.f32 %v1112_v14, %v1009_v21 }
 0x2a6   : > { %v1800_v15 = vpop.f32.mrf.mxu0 }
 0x2a7   : > { %v1202_v26 = vadd.f32 %v1201_v9, %v1113_v25 }
 0x2bd   : > { %v1407_v7 = vpop.f32.mrf.mxu1 }
 0x2bf   : > { %v1905_v22 = vpop.f32.mrf.mxu1 }
 0x2c5   : > { %v1320_v27 = vpop.f32.mrf.mxu0 }
 0x2c6   : > { %v1321_v31 = vadd.f32 %v1320_v27, %v1202_v26 }
 0x2c7   : > { %v1870_v32 = vpop.f32.mrf.mxu0 }
 0x2c8   : > { %v1408_v33 = vadd.f32 %v1407_v7, %v1321_v31 }
 0x2ca   : > { %v1411_v38 = vadd.f32 %v1408_v33, %v2099_v0 }
 0x2cc   : > { %1412 = vst.msk [vmem:[%s215_s9] sm:$0xff] %vm221_vm0, %v1411_v38 }
 0x2cd   : > { %1964 = shalt.err (!%p1961_p3)
}
 0x2ce   : > { %s1965_s23 = scalar_lea.hbm %s1425_s13, 128  ;;  %s1969_s30 = scalar_lea.hbm %s2670_s5, 256 }
 0x2cf   : > { %p1966_p4 = scmp.ne.s32.totalorder %s1425_s13, %s1965_s23  ;;  %p1970_p9 = scmp.lt.s32.totalorder %s1425_s13, %s2670_s5 }
 0x2d0   : > { %p1971_p10 = scmp.lt.s32.totalorder %s1969_s30, %s1965_s23 }
 0x2d1   : > { %p1967_p7 = pnand %p1966_p4, %p2084_p5 }
 0x2d2   : > { %p1972_p11 = por %p1971_p10, %p1970_p9 }
 0x2d3   : > { %p1968_p8 = pneg %p1967_p7 }
 0x2d5   : > { %p1973_p12 = pnand %p1972_p11, %p1968_p8 }
 0x2d7   : > { %1976 = shalt.err (!%p1973_p12)
}
 0x2d8   : > { %1906 = dma.vmem_to_hbm [thread:$0]  (%p2084_p5), %s1428_s10, 128, %s1425_s13, %s1414_s14  }
 0x2d9 PF: > { %p1912_p13 = scmp.ge.s32.totalorder %s2011_s21, 2  ;;  %s1439_s8 = sand.u32 1, %s1999_s18  }
 0x2da   : > { %s1440_s9 = scalar_lea.sflag [#allocation3], %s1439_s8 }
 0x2db   : > { %p1909_p0 = pnand %p1912_p13, %p2088_p6 }
 0x2dd   : > { %p1910_p1 = pneg %p1909_p0 }
 0x2df   : > { %1994 = dma.done.wait (%p1910_p1), %s1440_s9, 128  }
 0x2e0   : > { %1996 = vsyncadd (%p1910_p1), %s1440_s9, 4294967168  ;;  %p15_p2 = scmp.ge.s32.totalorder %s2071_s24, 4   ;;  %s2685_s18 = smov %s2003_s19 }
 0x2e1   : > { %s2686_s19 = smov %s2007_s20  ;;  %s2687_s20 = smov %s2082_s27 }
 0x2e2   : > { %s2688_s21 = smov %s2071_s24  ;;  %17 = sbr.rel (!%p15_p2) target bundleno = 3 (0x3), region = 75 }
 0x2e7   :  { %1445 = vsyncpa [#allocation3], 1 }
 0x2e8   :  { %1447 = vsyncpa [#allocation3 + $0x1], 1 }

</bundles_post_ra>
